<compile_context>
chip_gen: v5e
topology: v5e:2x2
jax: 0.10.0
libtpu: 0.0.40
codegen_flags: <defaults>
</compile_context>

<pallas_src>
import functools

import jax
import jax.numpy as jnp
from jax.experimental import pallas as pl
from jax.experimental.pallas import tpu as pltpu


def _round_up(v, m):
    return ((v + m - 1) // m) * m


def _cdiv(a, b):
    return (a + b - 1) // b


# Row indices inside the packed `tail` operand.
_ROW_B1, _ROW_B2, _ROW_B3, _ROW_WL, _ROW_BL = 0, 1, 2, 3, 4


def mlp_kernel(x_ref, w_ref, tail_ref, o_ref, *, n_in, h, o1, o2, o3):
    """Fused MLP tile.

    x_ref    : (tb, n_in) f32  -- batch tile (auto double-buffered / pipelined)
    w_ref    : (Kp, h)   bf16  -- w1|w2|w3 stacked on 16-row-aligned segments
    tail_ref : (8, h)    f32   -- rows: b1, b2, b3, last-layer weight, last bias
    o_ref    : (1, 1, tb) f32  -- lane-dense output row for this tile
    """
    xb = x_ref[...].astype(jnp.bfloat16)

    w1 = w_ref[o1:o1 + n_in, :]
    w2 = w_ref[o2:o2 + h, :]
    w3 = w_ref[o3:o3 + h, :]

    b1 = tail_ref[_ROW_B1:_ROW_B1 + 1, :]
    b2 = tail_ref[_ROW_B2:_ROW_B2 + 1, :]
    b3 = tail_ref[_ROW_B3:_ROW_B3 + 1, :]
    bl = tail_ref[_ROW_BL:_ROW_BL + 1, 0:1]

    # bf16 operands on the MXU, f32 accumulation; bias add / ReLU in f32 (VPU).
    a = jnp.dot(xb, w1, preferred_element_type=jnp.float32) + b1
    a = jnp.maximum(a, 0.0)
    a = jnp.dot(a.astype(jnp.bfloat16), w2, preferred_element_type=jnp.float32) + b2
    a = jnp.maximum(a, 0.0)
    a = jnp.dot(a.astype(jnp.bfloat16), w3, preferred_element_type=jnp.float32) + b3
    a = jnp.maximum(a, 0.0)

    # Last layer Linear(h -> 1), computed against the transposed activations so
    # the result is a lane-dense (1, tb) row (full-width vst + dense writeback)
    # instead of a (tb, 1) column of masked single-lane stores.  The whole
    # (8, h) tail is used as the LHS so the MXU sees a full 8-row operand; only
    # row _ROW_WL (the last-layer weight) is kept.
    tail_bf = tail_ref[...].astype(jnp.bfloat16)                 # (8, h)
    prod = jnp.dot(tail_bf, a.astype(jnp.bfloat16).T,
                   preferred_element_type=jnp.float32)           # (8, tb)
    out_row = prod[_ROW_WL:_ROW_WL + 1, :] + bl                  # (1, tb)
    o_ref[...] = out_row[None].astype(o_ref.dtype)               # (1, 1, tb)


def _choose_tile(batch):
    """Pick (tb, padded, grid) for the batch axis."""
    if batch < 512:
        # Small batch: single grid step, rows rounded only to the 8-row sublane
        # quantum.  (At these sizes pallas_call fixed cost dominates anyway; a
        # pure-XLA fallback would also be reasonable here.)
        tb = _round_up(max(batch, 1), 8)
        return tb, tb, 1
    # Large batch: big tiles so the ~0.35us/step fixed pipeline overhead is
    # amortized, and an even grid >= 2 so v7x can split the batch axis across
    # both TensorCores.  256-row granularity is fine on all of v5e/v6e/v7x
    # (v5e would be happy with 128; the extra padding is negligible).
    cap = 4096
    padded = _round_up(batch, 512)
    grid = max(2, _cdiv(padded, cap))
    if grid % 2:
        grid += 1
    tb = _round_up(_cdiv(padded, grid), 256)
    padded = tb * grid
    return tb, padded, grid


def _pack_params(params):
    """Pack weights/biases into two small VMEM-resident operands."""
    (w1, b1), (w2, b2), (w3, b3), (wl, bl) = params
    n_in, h1 = w1.shape
    h2 = w2.shape[1]
    h3 = w3.shape[1]
    assert h1 == h2 == h3, "packed-weight layout assumes equal hidden widths"
    assert wl.shape == (h3, 1) and bl.shape == (1,)
    h = h1

    # Stack w1|w2|w3 along rows; pad each segment to a multiple of 16 rows so
    # the in-kernel slices stay aligned to the bf16 (16, 128) sublane tile.
    segs, offs, off = [], [], 0
    for w in (w1, w2, w3):
        k = w.shape[0]
        kp = _round_up(k, 16)
        segs.append(jnp.pad(w, ((0, kp - k), (0, 0))))
        offs.append(off)
        off += kp
    w_hidden = jnp.concatenate(segs, axis=0).astype(jnp.bfloat16)

    tail = jnp.zeros((8, h), jnp.float32)
    tail = (tail.at[_ROW_B1].set(b1)
                .at[_ROW_B2].set(b2)
                .at[_ROW_B3].set(b3)
                .at[_ROW_WL].set(wl[:, 0])
                .at[_ROW_BL, 0].set(bl[0]))
    return w_hidden, tail, (n_in, h, tuple(offs))


@jax.jit
def optimize_net_v2_forward(x, params):
    """Pallas-backed forward pass of OptimizeNet_v2. Returns squeezed output."""
    w_hidden, tail, (n_in, h, (o1, o2, o3)) = _pack_params(params)

    batch = x.shape[0]
    tb, padded, grid = _choose_tile(batch)
    x_p = x if padded == batch else jnp.pad(x, ((0, padded - batch), (0, 0)))

    kernel = functools.partial(mlp_kernel, n_in=n_in, h=h, o1=o1, o2=o2, o3=o3)

    flops = 2 * padded * (n_in * h + 2 * h * h + h)
    bytes_accessed = (padded * (n_in * 4 + 4)
                      + w_hidden.size * 2 + tail.size * 4)

    out = pl.pallas_call(
        kernel,
        out_shape=jax.ShapeDtypeStruct((grid, 1, tb), jnp.float32),
        grid_spec=pltpu.PrefetchScalarGridSpec(
            num_scalar_prefetch=0,
            grid=(grid,),
            in_specs=[
                pl.BlockSpec((tb, n_in), lambda i: (i, 0)),        # x: pipelined
                pl.BlockSpec(w_hidden.shape, lambda i: (0, 0)),    # weights: resident
                pl.BlockSpec(tail.shape, lambda i: (0, 0)),        # biases/last: resident
            ],
            out_specs=pl.BlockSpec((1, 1, tb), lambda i: (i, 0, 0)),
        ),
        compiler_params=pltpu.CompilerParams(
            dimension_semantics=("parallel",),
            vmem_limit_bytes=40 * 1024 * 1024),
        cost_estimate=pl.CostEstimate(
            flops=flops, transcendentals=0, bytes_accessed=bytes_accessed),
    )(x_p, w_hidden, tail)

    # (grid, 1, tb) -> (padded,) -> drop batch padding (garbage rows from the
    # zero-padded inputs are sliced off here and never consumed).
    # jnp.squeeze matches torch's x.squeeze() (scalar when batch == 1).
    return jnp.squeeze(out.reshape(-1)[:batch])


def init_params(key, n_inputs, h1, h2, h3):
    """Deterministic init mimicking nn.Linear (uniform +-1/sqrt(fan_in))."""
    def linear(key, fan_in, fan_out):
        kw, kb = jax.random.split(key)
        bound = 1.0 / jnp.sqrt(jnp.float32(fan_in))
        w = jax.random.uniform(kw, (fan_in, fan_out), jnp.float32, -bound, bound)
        b = jax.random.uniform(kb, (fan_out,), jnp.float32, -bound, bound)
        return w, b

    k1, k2, k3, k4 = jax.random.split(key, 4)
    return (
        linear(k1, n_inputs, h1),
        linear(k2, h1, h2),
        linear(k3, h2, h3),
        linear(k4, h3, 1),
    )


def reference_forward(x, params):
    """Pure-JAX reference mirroring the kernel's bf16-in / f32-accum contract."""
    (w1, b1), (w2, b2), (w3, b3), (wl, bl) = params
    bf = jnp.bfloat16
    f32 = jnp.float32
    h = jnp.maximum(jnp.dot(x.astype(bf), w1.astype(bf),
                            preferred_element_type=f32) + b1, 0.0)
    h = jnp.maximum(jnp.dot(h.astype(bf), w2.astype(bf),
                            preferred_element_type=f32) + b2, 0.0)
    h = jnp.maximum(jnp.dot(h.astype(bf), w3.astype(bf),
                            preferred_element_type=f32) + b3, 0.0)
    out = jnp.dot(h.astype(bf), wl.astype(bf), preferred_element_type=f32) + bl
    return jnp.squeeze(out)


if __name__ == "__main__":
    n_inputs = 16
    h1 = h2 = h3 = 32

    key = jax.random.PRNGKey(0)
    kx, kp, kx2 = jax.random.split(key, 3)
    params = init_params(kp, n_inputs, h1, h2, h3)

    # Small batch: exercises the grid=1 / 8-row-rounded path.
    x = jax.random.normal(kx, (8, n_inputs), dtype=jnp.float32)
    y = jax.block_until_ready(optimize_net_v2_forward(x, params))
    y_ref = reference_forward(x, params)
    assert y.shape == (8,), f"unexpected output shape {y.shape}"
    assert jnp.allclose(y, y_ref, atol=5e-3, rtol=5e-3), "mismatch (small batch)"

    # Larger batch: exercises the even-grid (grid=2), padded, multi-tile path.
    x2 = jax.random.normal(kx2, (640, n_inputs), dtype=jnp.float32)
    y2 = jax.block_until_ready(optimize_net_v2_forward(x2, params))
    y2_ref = reference_forward(x2, params)
    assert y2.shape == (640,), f"unexpected output shape {y2.shape}"
    assert jnp.allclose(y2, y2_ref, atol=5e-3, rtol=5e-3), "mismatch (tiled batch)"

    print("KERNEL_OK")
</pallas_src>

<mosaic_0001>
module attributes {stable_mosaic.version = 11 : i64} {
  func.func @mlp_kernel(%arg0: i32, %arg1: memref<8x16xf32, #tpu.memory_space<vmem>>, %arg2: memref<80x32xbf16, #tpu.memory_space<vmem>>, %arg3: memref<8x32xf32, #tpu.memory_space<vmem>>, %arg4: memref<1x1x8xf32, #tpu.memory_space<vmem>>) attributes {dimension_semantics = [#tpu.dimension_semantics<parallel>], iteration_bounds = array<i64: 1>, scalar_prefetch = 0 : i64, scratch_operands = 0 : i64, tpu.core_type = #tpu.core_type<tc>, window_params = [{transform_indices = @transform_0, window_bounds = array<i64: 8, 16>}, {pipeline_mode = #tpu.pipeline_mode<synchronous>, transform_indices = @transform_1, window_bounds = array<i64: 80, 32>}, {pipeline_mode = #tpu.pipeline_mode<synchronous>, transform_indices = @transform_2, window_bounds = array<i64: 8, 32>}, {transform_indices = @transform_3, window_bounds = array<i64: 1, 1, 8>}]} {
    %c0 = arith.constant 0 : index
    %c0_0 = arith.constant 0 : index
    %0 = vector.load %arg1[%c0, %c0_0] : memref<8x16xf32, #tpu.memory_space<vmem>>, vector<8x16xf32>
    %1 = arith.truncf %0 : vector<8x16xf32> to vector<8x16xbf16>
    %c0_1 = arith.constant 0 : index
    %c0_2 = arith.constant 0 : index
    %2 = vector.load %arg2[%c0_1, %c0_2] : memref<80x32xbf16, #tpu.memory_space<vmem>>, vector<16x32xbf16>
    %c16 = arith.constant 16 : index
    %c0_3 = arith.constant 0 : index
    %3 = vector.load %arg2[%c16, %c0_3] : memref<80x32xbf16, #tpu.memory_space<vmem>>, vector<32x32xbf16>
    %c48 = arith.constant 48 : index
    %c0_4 = arith.constant 0 : index
    %4 = vector.load %arg2[%c48, %c0_4] : memref<80x32xbf16, #tpu.memory_space<vmem>>, vector<32x32xbf16>
    %c0_5 = arith.constant 0 : index
    %c0_6 = arith.constant 0 : index
    %5 = vector.load %arg3[%c0_5, %c0_6] : memref<8x32xf32, #tpu.memory_space<vmem>>, vector<1x32xf32>
    %c1 = arith.constant 1 : index
    %c0_7 = arith.constant 0 : index
    %6 = vector.load %arg3[%c1, %c0_7] : memref<8x32xf32, #tpu.memory_space<vmem>>, vector<1x32xf32>
    %c2 = arith.constant 2 : index
    %c0_8 = arith.constant 0 : index
    %7 = vector.load %arg3[%c2, %c0_8] : memref<8x32xf32, #tpu.memory_space<vmem>>, vector<1x32xf32>
    %c4 = arith.constant 4 : index
    %c0_9 = arith.constant 0 : index
    %8 = vector.load %arg3[%c4, %c0_9] : memref<8x32xf32, #tpu.memory_space<vmem>>, vector<1x1xf32>
    %cst = arith.constant dense<0.000000e+00> : vector<8x32xf32>
    %9 = tpu.matmul %1, %2, %cst {dimension_numbers = #tpu.dot_dimension_numbers<[1], [0], [0], [1], [0, 0, 1, 1], [], []>} : vector<8x16xbf16>, vector<16x32xbf16>, vector<8x32xf32> -> vector<8x32xf32>
    %10 = vector.broadcast %5 : vector<1x32xf32> to vector<8x32xf32>
    %11 = arith.addf %9, %10 : vector<8x32xf32>
    %cst_10 = arith.constant 0.000000e+00 : f32
    %12 = vector.broadcast %cst_10 : f32 to vector<8x32xf32>
    %13 = arith.maximumf %11, %12 : vector<8x32xf32>
    %14 = arith.truncf %13 : vector<8x32xf32> to vector<8x32xbf16>
    %cst_11 = arith.constant dense<0.000000e+00> : vector<8x32xf32>
    %15 = tpu.matmul %14, %3, %cst_11 {dimension_numbers = #tpu.dot_dimension_numbers<[1], [0], [0], [1], [0, 0, 1, 1], [], []>} : vector<8x32xbf16>, vector<32x32xbf16>, vector<8x32xf32> -> vector<8x32xf32>
    %16 = vector.broadcast %6 : vector<1x32xf32> to vector<8x32xf32>
    %17 = arith.addf %15, %16 : vector<8x32xf32>
    %cst_12 = arith.constant 0.000000e+00 : f32
    %18 = vector.broadcast %cst_12 : f32 to vector<8x32xf32>
    %19 = arith.maximumf %17, %18 : vector<8x32xf32>
    %20 = arith.truncf %19 : vector<8x32xf32> to vector<8x32xbf16>
    %cst_13 = arith.constant dense<0.000000e+00> : vector<8x32xf32>
    %21 = tpu.matmul %20, %4, %cst_13 {dimension_numbers = #tpu.dot_dimension_numbers<[1], [0], [0], [1], [0, 0, 1, 1], [], []>} : vector<8x32xbf16>, vector<32x32xbf16>, vector<8x32xf32> -> vector<8x32xf32>
    %22 = vector.broadcast %7 : vector<1x32xf32> to vector<8x32xf32>
    %23 = arith.addf %21, %22 : vector<8x32xf32>
    %cst_14 = arith.constant 0.000000e+00 : f32
    %24 = vector.broadcast %cst_14 : f32 to vector<8x32xf32>
    %25 = arith.maximumf %23, %24 : vector<8x32xf32>
    %c0_15 = arith.constant 0 : index
    %c0_16 = arith.constant 0 : index
    %26 = vector.load %arg3[%c0_15, %c0_16] : memref<8x32xf32, #tpu.memory_space<vmem>>, vector<8x32xf32>
    %27 = arith.truncf %26 : vector<8x32xf32> to vector<8x32xbf16>
    %28 = arith.truncf %25 : vector<8x32xf32> to vector<8x32xbf16>
    %29 = tpu.transpose %28, [1, 0] : vector<8x32xbf16> -> vector<32x8xbf16>
    %cst_17 = arith.constant dense<0.000000e+00> : vector<8x8xf32>
    %30 = tpu.matmul %27, %29, %cst_17 {dimension_numbers = #tpu.dot_dimension_numbers<[1], [0], [0], [1], [0, 0, 1, 1], [], []>} : vector<8x32xbf16>, vector<32x8xbf16>, vector<8x8xf32> -> vector<8x8xf32>
    %31 = vector.extract_strided_slice %30 {offsets = [3, 0], sizes = [1, 8], strides = [1, 1]} : vector<8x8xf32> to vector<1x8xf32>
    %32 = vector.broadcast %8 : vector<1x1xf32> to vector<1x8xf32>
    %33 = arith.addf %31, %32 : vector<1x8xf32>
    %34 = vector.shape_cast %33 : vector<1x8xf32> to vector<1x1x8xf32>
    %c0_18 = arith.constant 0 : index
    %c0_19 = arith.constant 0 : index
    %c0_20 = arith.constant 0 : index
    %35 = vector.load %arg4[%c0_18, %c0_19, %c0_20] : memref<1x1x8xf32, #tpu.memory_space<vmem>>, vector<1x1x8xf32>
    tpu.vector_store %arg4[%c0_18, %c0_19, %c0_20], %34 {strides = array<i32>} : memref<1x1x8xf32, #tpu.memory_space<vmem>>, vector<1x1x8xf32>,
    return
  }
  func.func @transform_0(%arg0: i32) -> (i32, i32) {
    %c0_i32 = arith.constant 0 : i32
    %c0_i32_0 = arith.constant 0 : i32
    return %arg0, %c0_i32 : i32, i32
  }
  func.func @transform_1(%arg0: i32) -> (i32, i32) {
    %c0_i32 = arith.constant 0 : i32
    %c0_i32_0 = arith.constant 0 : i32
    %c0_i32_1 = arith.constant 0 : i32
    return %c0_i32, %c0_i32_0 : i32, i32
  }
  func.func @transform_2(%arg0: i32) -> (i32, i32) {
    %c0_i32 = arith.constant 0 : i32
    %c0_i32_0 = arith.constant 0 : i32
    %c0_i32_1 = arith.constant 0 : i32
    return %c0_i32, %c0_i32_0 : i32, i32
  }
  func.func @transform_3(%arg0: i32) -> (i32, i32, i32) {
    %c0_i32 = arith.constant 0 : i32
    %c0_i32_0 = arith.constant 0 : i32
    %c0_i32_1 = arith.constant 0 : i32
    return %arg0, %c0_i32, %c0_i32_0 : i32, i32, i32
  }
}

</mosaic_0001>

<bundles_post_ra>
// kernel: optimize_net_v2_forward.1
= control target key start
LH: loop header
LB: loop body
LE: loop exit
PB: predicated region body
PF: predicated region fallthrough
CT: control target
= control target key end

     0   :  { %vm39_vm0 = vcmask 130048   ;;  %s290_s0 = inlined_call_operand.vmem [shape: f32[8,16], index: 0, kind: input, shape index: {}]   ;;  %s291_s1 = inlined_call_operand.vmem [shape: bf16[80,32], index: 1, kind: input, shape index: {}]   ;;  %s292_s2 = inlined_call_operand.vmem [shape: f32[8,32], index: 2, kind: input, shape index: {}]   ;;  %s293_s3 = inlined_call_operand.hbm [shape: f32[1,1,8], index: 3, kind: output, shape index: {}]  }
   0x1   :  { %v191_v0 = vld [vmem:[%s291_s1] sm:$0xff] }
   0x2   :  { %v16_v1 = vld [vmem:[%s290_s0] sm:$0xff]  ;;  %50 = vmatpush.bf16.msra.mxu0 %v191_v0 }
   0x3   :  { %v17_v2 = vpack.c.bf16 %v16_v1, %v16_v1 }
   0x4   :  { %8 = vsyncpa [#allocation3], 0  ;;  %v193_v3 = vld [vmem:[%s291_s1 + $0x10] sm:$0xff]  ;;  %v192_v4 = vld [vmem:[%s291_s1 + $0x8] sm:$0xff]  ;;  %vm71_vm1 = vcmask 261120   ;;  %v228_v20 = vmov 0  }
   0x5   :  { %171 = vmatmul.msk.bf16.vlgmr.msra.gmra.mxu0 %vm39_vm0, %v17_v2  ;;  %81 = vmatpush.bf16.msra.mxu1 %v193_v3  ;;  %v199_v5 = vld [vmem:[%s292_s2] ss:$0 sm:$0xff]  ;;  %v194_v12 = vld [vmem:[%s291_s1 + $0x18] sm:$0xff]  ;;  %v200_v13 = vld [vmem:[%s292_s2 + $0x1] ss:$0 sm:$0xff]  ;;  %s229_s5 = smov [#allocation2]  }
   0x6   :  { %v195_v11 = vld [vmem:[%s291_s1 + $0x20] sm:$0xff]  ;;  %198 = vset.pattern.permute.xlu0 %v228_v20  ;;  %s156_s6 = sshll.u32 %s229_s5, 4  ;;  %s158_s9 = sshll.u32 %s293_s3, 4  ;;  %vm149_vm2 = vcmask 60419   ;;  %s157_s6 = int_to_ptr.vmem [resolvable:$true] %s156_s6  ;;  %s159_s9 = int_to_ptr.hbm [resolvable:$true] %s158_s9 }
   0x7   :  { %112 = vmatpush.bf16.msra.mxu2 %v195_v11  ;;  %v31_v19 = vld [vmem:[%s292_s2 + $0x4] sm:$0x1]  ;;  %v201_v21 = vld [vmem:[%s292_s2 + $0x2] ss:$0 sm:$0xff] }
   0x8   :  { %144 = vperm.xlu0 %198, %v31_v19   ;;  %v120_v28 = vld [vmem:[%s292_s2] sm:$0xff] }
   0x9   :  { %82 = vmatpush.bf16.msra.mxu1 %v192_v4  ;;  %v121_v29 = vpack.c.bf16 %v120_v28, %v120_v28 }
   0xb   :  { %113 = vmatpush.bf16.msra.mxu2 %v194_v12 }
  0x7a   :  { %v145_v30 = vpop.permute.xlu0 %144 }
  0x7b   :  { %v146_v31 = vrot.slane %v145_v30, 5 }
  0x82   :  { %v52_v6 = vpop.f32.mrf.mxu0 }
  0x83   :  { %v53_v7 = vadd.f32 %v199_v5, %v52_v6 }
  0x85   :  { %v56_v8 = vmax.f32 %v53_v7, 0.0 }
  0x87   :  { %v57_v9 = vpack.c.bf16 %v56_v8, %v56_v8 }
  0x89   :  { %180 = vmatmul.msk.bf16.vlgmr.msra.gmra.mxu1 %vm71_vm1, %v57_v9 }
  0x8a   :  { %v54_v10 = vpop.f32.mrf.mxu0 }
 0x106   :  { %v84_v14 = vpop.f32.mrf.mxu1 }
 0x107   :  { %v85_v15 = vadd.f32 %v200_v13, %v84_v14 }
 0x109   :  { %v88_v16 = vmax.f32 %v85_v15, 0.0 }
 0x10b   :  { %v89_v17 = vpack.c.bf16 %v88_v16, %v88_v16 }
 0x10d   :  { %189 = vmatmul.msk.bf16.vlgmr.msra.gmra.mxu2 %vm71_vm1, %v89_v17 }
 0x10e   :  { %v86_v18 = vpop.f32.mrf.mxu1 }
 0x190   :  { %v115_v22 = vpop.f32.mrf.mxu2 }
 0x191   :  { %v116_v23 = vadd.f32 %v201_v21, %v115_v22 }
 0x193   :  { %v119_v24 = vmax.f32 %v116_v23, 0.0 }
 0x195   :  { %v122_v25 = vpack.c.bf16 %v119_v24, %v119_v24 }
 0x197   :  { %v127_v26 = vsel %vm71_vm1, %v122_v25, 0 }
 0x198   :  { %v117_v27 = vpop.f32.mrf.mxu2  ;;  %136 = vmatpush.bf16.xpose.msra.mxu3 %v127_v26 }
 0x19f   :  { %190 = vmatmul.msk.bf16.vlgmr.msra.gmra.mxu3 %vm71_vm1, %v121_v29 }
 0x222   :  { %v138_v32 = vpop.f32.mrf.mxu3 }
 0x223   :  { %v148_v33 = vadd.f32 %v146_v31, %v138_v32 }
 0x225   :  { %150 = vst.msk [vmem:[#allocation2 - $0x3] sm:$0x8] %vm149_vm2, %v148_v33 }
 0x226   :  { %161 = dma.vmem_to_hbm [thread:$0]  %s157_s6, 16, %s159_s9, [#allocation3]  }
 0x22a   :  { %v140_v34 = vpop.f32.mrf.mxu3 }
 0x22b   :  { %226 = dma.done.wait [#allocation3], 16  }
 0x22c   :  { %227 = vsyncadd [#allocation3], 4294967280 }
 0x22d   :  { %166 = vsyncpa [#allocation3], 1 }

</bundles_post_ra>
